<compile_context>
chip_gen: v7x
topology: tpu7x:2x2x1
jax: 0.10.0
libtpu: 0.0.40
codegen_flags: <defaults>
</compile_context>

<pallas_src>
import functools
import math

import numpy as np

import jax
import jax.numpy as jnp
from jax.experimental import pallas as pl
from jax.experimental.pallas import tpu as pltpu


# ---------------------------------------------------------------------------
# Frequency-count logic (mirrors the PyTorch __init__ exactly).
# ---------------------------------------------------------------------------
def _get_num_frequencies_nyquist(samples):
    nyquist_rate = 1 / (2 * (2 * 1 / samples))
    return int(math.floor(math.log(nyquist_rate, 2)))


def _num_frequencies(in_features, sidelength=None, fn_samples=None, use_nyquist=True):
    if in_features == 3:
        return 10
    elif in_features == 2:
        assert sidelength is not None
        if isinstance(sidelength, int):
            sidelength = (sidelength, sidelength)
        nf = 4
        if use_nyquist:
            nf = _get_num_frequencies_nyquist(min(sidelength[0], sidelength[1]))
        return nf
    elif in_features == 1:
        fn_samples = sidelength          # mirrors the torch module (quirk included)
        nf = 4
        if use_nyquist:
            nf = _get_num_frequencies_nyquist(fn_samples)
        return nf
    else:
        return 4


def _round_up(x, m):
    return ((x + m - 1) // m) * m


# ---------------------------------------------------------------------------
# Compile-time constant tables.
# ---------------------------------------------------------------------------
def _build_tables(in_features, num_frequencies, out_dim, points_per_row):
    """Gather+scale matrix, coord-lane mask and per-lane phase.

    w[q, m] with q = p*F + j, m = p*out_dim + k is:
        1.0        if k == j                        (coordinate passthrough)
        2^i * pi   if k in {F + 2*(i*F+j), +1}      (sin / cos channel of feature j)
        0.0        otherwise
    mode[m]:  0 = passthrough lane, 1 = trig lane.
    phase[m]: 0 on sin lanes, pi/2 on cos lanes (cos(a) == sin(a + pi/2)).
    """
    F, L, P = in_features, num_frequencies, points_per_row
    w1 = np.zeros((F, out_dim), dtype=np.float32)
    mode1 = np.zeros((out_dim,), dtype=np.int32)
    phase1 = np.zeros((out_dim,), dtype=np.float32)
    half_pi = np.float32(0.5 * math.pi)
    for j in range(F):
        w1[j, j] = 1.0
        mode1[j] = 0
    for i in range(L):
        scale = np.float32((2.0 ** i) * math.pi)
        for j in range(F):
            k = F + 2 * (i * F + j)
            w1[j, k] = scale
            w1[j, k + 1] = scale
            mode1[k] = 1
            mode1[k + 1] = 1
            phase1[k] = 0.0
            phase1[k + 1] = half_pi
    w = np.kron(np.eye(P, dtype=np.float32), w1)       # (P*F, P*out_dim), block diagonal
    mode = np.tile(mode1, P)[None, :]                  # (1, P*out_dim)
    phase = np.tile(phase1, P)[None, :]                # (1, P*out_dim)
    return jnp.asarray(w), jnp.asarray(mode), jnp.asarray(phase)


# ---------------------------------------------------------------------------
# Kernel: one dense elementwise pipeline per tile (single dense sin).
# ---------------------------------------------------------------------------
def _pos_enc_kernel(w_ref, mode_ref, phase_ref, x_ref, o_ref, *,
                    in_features, points_per_row):
    # x_ref:     (rows, P*F)        P points packed per row (their F coords each)
    # w_ref:     (P*F, P*out_dim)   constant gather+scale matrix (block diagonal)
    # mode_ref:  (1,   P*out_dim)   0 = passthrough lane, 1 = trig lane
    # phase_ref: (1,   P*out_dim)   0 on sin lanes, pi/2 on cos lanes
    # o_ref:     (rows, P*out_dim)  encoded output, same point packing as x_ref
    x = x_ref[...].astype(jnp.float32)

    # Dense per-channel "angles": a[:, m] = coord(feat(m)) * scale(m).  Each lane has
    # exactly one nonzero term, so the result is bit-identical to c * f32(2^i*pi)
    # (or to c itself on passthrough lanes).  Broadcast + mul/add only.
    a = x[:, 0:1] * w_ref[0:1, :]
    for q in range(1, points_per_row * in_features):
        a = a + x[:, q:q + 1] * w_ref[q:q + 1, :]

    # ONE dense sin (phase trick replaces the previous dense sin AND dense cos),
    # then a single select to pass coordinates through untouched.
    trig = jnp.sin(a + phase_ref[...])
    enc = jnp.where(mode_ref[...] == 0, a, trig)
    o_ref[...] = enc.astype(o_ref.dtype)


# ---------------------------------------------------------------------------
# Wrapper (forward pass).
# ---------------------------------------------------------------------------
def pos_encoding(coords, in_features, sidelength=None, fn_samples=None,
                 use_nyquist=True, *, tile_points=16384, points_per_row=2,
                 out_dtype=None, min_grid_steps=8):
    """JAX/Pallas equivalent of PosEncoding.forward (channel order preserved)."""
    F = in_features
    L = _num_frequencies(F, sidelength, fn_samples, use_nyquist)
    out_dim = F + 2 * F * L
    out_dtype = coords.dtype if out_dtype is None else jnp.dtype(out_dtype)

    B = coords.shape[0]
    coords = coords.reshape(B, -1, F)              # same as torch .view(B, -1, F)
    N = coords.shape[1]
    M = B * N
    P = max(1, int(points_per_row))

    # Rows per tile (tn / P) must be a multiple of 8 (sublanes).  Cap the tile so the
    # 1-D parallel grid has >= min_grid_steps steps when the input is big enough
    # (keeps both v7x TensorCores busy); otherwise use the smallest legal tile.
    step = 8 * P
    tn = min(_round_up(tile_points, step),
             max(step, _round_up(-(-M // max(1, min_grid_steps)), step)))
    Mp = _round_up(M, tn)

    flat = coords.reshape(M, F)
    if Mp != M:
        flat = jnp.pad(flat, ((0, Mp - M), (0, 0)))    # ragged tail handled by padding
    packed = flat.reshape(Mp // P, P * F)              # free contiguous reshape

    w, mode, phase = _build_tables(F, L, out_dim, P)
    rows = tn // P

    kernel = functools.partial(_pos_enc_kernel, in_features=F, points_per_row=P)

    in_size = jnp.dtype(coords.dtype).itemsize
    out_size = jnp.dtype(out_dtype).itemsize
    cost = pl.CostEstimate(
        flops=int(Mp) * out_dim * (2 * P * F + 2),     # angle build + phase/select
        transcendentals=int(Mp) * out_dim,             # one dense sin per output lane
        bytes_accessed=int(Mp) * (F * in_size + out_dim * out_size),
    )

    out = pl.pallas_call(
        kernel,
        out_shape=jax.ShapeDtypeStruct((Mp // P, P * out_dim), out_dtype),
        grid_spec=pltpu.PrefetchScalarGridSpec(
            num_scalar_prefetch=0,
            grid=(Mp // tn,),                                          # one flat parallel axis
            in_specs=[
                pl.BlockSpec((P * F, P * out_dim), lambda i: (0, 0)),  # w (tiny constant)
                pl.BlockSpec((1, P * out_dim), lambda i: (0, 0)),      # mode (tiny constant)
                pl.BlockSpec((1, P * out_dim), lambda i: (0, 0)),      # phase (tiny constant)
                pl.BlockSpec((rows, P * F), lambda i: (i, 0)),         # packed coords
            ],
            out_specs=pl.BlockSpec((rows, P * out_dim), lambda i: (i, 0)),
        ),
        compiler_params=pltpu.CompilerParams(
            dimension_semantics=("parallel",),
            vmem_limit_bytes=32 * 1024 * 1024,         # double-buffered tiles ~16 MiB
        ),
        cost_estimate=cost,
    )(w, mode, phase, packed)

    out = out.reshape(Mp, out_dim)                     # free contiguous reshape
    if Mp != M:
        out = out[:M]
    return out.reshape(B, N, out_dim)


# ---------------------------------------------------------------------------
# Pure-JAX reference mirroring the torch loop (for correctness checks).
# ---------------------------------------------------------------------------
def _reference(coords, in_features, num_frequencies):
    B = coords.shape[0]
    c = coords.reshape(B, -1, in_features)
    parts = [c]
    for i in range(num_frequencies):
        for j in range(in_features):
            ang = (2.0 ** i) * math.pi * c[..., j]
            parts.append(jnp.sin(ang)[..., None])
            parts.append(jnp.cos(ang)[..., None])
    return jnp.concatenate(parts, axis=-1)


if __name__ == "__main__":
    key = jax.random.PRNGKey(0)
    k1, k2 = jax.random.split(key)

    # Case 1: NeRF case, in_features=3 -> L=10, out_dim = 3 + 2*3*10 = 63.
    # Top frequency angle ~ 2^9*pi ~ 1.6e3, so cos-as-sin(a+pi/2) lanes can deviate
    # from exact cos by ~0.5 ulp of the argument (~6e-5); 5e-4 atol covers that plus
    # any trig-implementation difference at large arguments.
    B, H, W3, F3 = 2, 16, 16, 3
    coords3 = jax.random.uniform(k1, (B, H, W3, F3), dtype=jnp.float32,
                                 minval=-1.0, maxval=1.0)
    out3 = jax.block_until_ready(pos_encoding(coords3, F3))
    nf3 = _num_frequencies(F3)
    ref3 = _reference(coords3, F3, nf3)
    assert out3.shape == (B, H * W3, F3 + 2 * F3 * nf3)
    assert jnp.allclose(out3[..., :F3], ref3[..., :F3], atol=1e-6, rtol=0)  # passthrough lanes
    assert jnp.allclose(out3, ref3, atol=5e-4, rtol=0)

    # Case 2: in_features=2 with sidelength -> L=4, ragged point count (exercises
    # padding and a non-default grid); angles are small so a tight tolerance holds.
    coords2 = jax.random.uniform(k2, (1, 300, 2), dtype=jnp.float32,
                                 minval=-1.0, maxval=1.0)
    out2 = jax.block_until_ready(pos_encoding(coords2, 2, sidelength=64))
    nf2 = _num_frequencies(2, sidelength=64)
    ref2 = _reference(coords2, 2, nf2)
    assert out2.shape == (1, 300, 2 + 2 * 2 * nf2)
    assert jnp.allclose(out2[..., :2], ref2[..., :2], atol=1e-6, rtol=0)
    assert jnp.allclose(out2, ref2, atol=1e-4, rtol=0)

    print("KERNEL_OK")
</pallas_src>

<mosaic_0001>
module attributes {stable_mosaic.version = 11 : i64} {
  func.func @_pos_enc_kernel(%arg0: i32, %arg1: memref<6x126xf32, #tpu.memory_space<vmem>>, %arg2: memref<1x126xi32, #tpu.memory_space<vmem>>, %arg3: memref<1x126xf32, #tpu.memory_space<vmem>>, %arg4: memref<32x6xf32, #tpu.memory_space<vmem>>, %arg5: memref<32x126xf32, #tpu.memory_space<vmem>>) attributes {dimension_semantics = [#tpu.dimension_semantics<parallel>], iteration_bounds = array<i64: 8>, scalar_prefetch = 0 : i64, scratch_operands = 0 : i64, tpu.core_type = #tpu.core_type<tc>, window_params = [{pipeline_mode = #tpu.pipeline_mode<synchronous>, transform_indices = @transform_0, window_bounds = array<i64: 6, 126>}, {pipeline_mode = #tpu.pipeline_mode<synchronous>, transform_indices = @transform_1, window_bounds = array<i64: 1, 126>}, {pipeline_mode = #tpu.pipeline_mode<synchronous>, transform_indices = @transform_2, window_bounds = array<i64: 1, 126>}, {transform_indices = @transform_3, window_bounds = array<i64: 32, 6>}, {transform_indices = @transform_4, window_bounds = array<i64: 32, 126>}]} {
    %c0 = arith.constant 0 : index
    %c0_0 = arith.constant 0 : index
    %0 = vector.load %arg4[%c0, %c0_0] : memref<32x6xf32, #tpu.memory_space<vmem>>, vector<32x6xf32>
    %1 = vector.extract_strided_slice %0 {offsets = [0, 0], sizes = [32, 1], strides = [1, 1]} : vector<32x6xf32> to vector<32x1xf32>
    %c0_1 = arith.constant 0 : index
    %c0_2 = arith.constant 0 : index
    %2 = vector.load %arg1[%c0_1, %c0_2] : memref<6x126xf32, #tpu.memory_space<vmem>>, vector<1x126xf32>
    %3 = vector.broadcast %1 : vector<32x1xf32> to vector<32x126xf32>
    %4 = vector.broadcast %2 : vector<1x126xf32> to vector<32x126xf32>
    %5 = arith.mulf %3, %4 : vector<32x126xf32>
    %6 = vector.extract_strided_slice %0 {offsets = [0, 1], sizes = [32, 1], strides = [1, 1]} : vector<32x6xf32> to vector<32x1xf32>
    %c1 = arith.constant 1 : index
    %c0_3 = arith.constant 0 : index
    %7 = vector.load %arg1[%c1, %c0_3] : memref<6x126xf32, #tpu.memory_space<vmem>>, vector<1x126xf32>
    %8 = vector.broadcast %6 : vector<32x1xf32> to vector<32x126xf32>
    %9 = vector.broadcast %7 : vector<1x126xf32> to vector<32x126xf32>
    %10 = arith.mulf %8, %9 : vector<32x126xf32>
    %11 = arith.addf %5, %10 : vector<32x126xf32>
    %12 = vector.extract_strided_slice %0 {offsets = [0, 2], sizes = [32, 1], strides = [1, 1]} : vector<32x6xf32> to vector<32x1xf32>
    %c2 = arith.constant 2 : index
    %c0_4 = arith.constant 0 : index
    %13 = vector.load %arg1[%c2, %c0_4] : memref<6x126xf32, #tpu.memory_space<vmem>>, vector<1x126xf32>
    %14 = vector.broadcast %12 : vector<32x1xf32> to vector<32x126xf32>
    %15 = vector.broadcast %13 : vector<1x126xf32> to vector<32x126xf32>
    %16 = arith.mulf %14, %15 : vector<32x126xf32>
    %17 = arith.addf %11, %16 : vector<32x126xf32>
    %18 = vector.extract_strided_slice %0 {offsets = [0, 3], sizes = [32, 1], strides = [1, 1]} : vector<32x6xf32> to vector<32x1xf32>
    %c3 = arith.constant 3 : index
    %c0_5 = arith.constant 0 : index
    %19 = vector.load %arg1[%c3, %c0_5] : memref<6x126xf32, #tpu.memory_space<vmem>>, vector<1x126xf32>
    %20 = vector.broadcast %18 : vector<32x1xf32> to vector<32x126xf32>
    %21 = vector.broadcast %19 : vector<1x126xf32> to vector<32x126xf32>
    %22 = arith.mulf %20, %21 : vector<32x126xf32>
    %23 = arith.addf %17, %22 : vector<32x126xf32>
    %24 = vector.extract_strided_slice %0 {offsets = [0, 4], sizes = [32, 1], strides = [1, 1]} : vector<32x6xf32> to vector<32x1xf32>
    %c4 = arith.constant 4 : index
    %c0_6 = arith.constant 0 : index
    %25 = vector.load %arg1[%c4, %c0_6] : memref<6x126xf32, #tpu.memory_space<vmem>>, vector<1x126xf32>
    %26 = vector.broadcast %24 : vector<32x1xf32> to vector<32x126xf32>
    %27 = vector.broadcast %25 : vector<1x126xf32> to vector<32x126xf32>
    %28 = arith.mulf %26, %27 : vector<32x126xf32>
    %29 = arith.addf %23, %28 : vector<32x126xf32>
    %30 = vector.extract_strided_slice %0 {offsets = [0, 5], sizes = [32, 1], strides = [1, 1]} : vector<32x6xf32> to vector<32x1xf32>
    %c5 = arith.constant 5 : index
    %c0_7 = arith.constant 0 : index
    %31 = vector.load %arg1[%c5, %c0_7] : memref<6x126xf32, #tpu.memory_space<vmem>>, vector<1x126xf32>
    %32 = vector.broadcast %30 : vector<32x1xf32> to vector<32x126xf32>
    %33 = vector.broadcast %31 : vector<1x126xf32> to vector<32x126xf32>
    %34 = arith.mulf %32, %33 : vector<32x126xf32>
    %35 = arith.addf %29, %34 : vector<32x126xf32>
    %c0_8 = arith.constant 0 : index
    %c0_9 = arith.constant 0 : index
    %36 = vector.load %arg3[%c0_8, %c0_9] : memref<1x126xf32, #tpu.memory_space<vmem>>, vector<1x126xf32>
    %37 = vector.broadcast %36 : vector<1x126xf32> to vector<32x126xf32>
    %38 = arith.addf %35, %37 : vector<32x126xf32>
    %39 = math.sin %38 : vector<32x126xf32>
    %c0_10 = arith.constant 0 : index
    %c0_11 = arith.constant 0 : index
    %40 = vector.load %arg2[%c0_10, %c0_11] : memref<1x126xi32, #tpu.memory_space<vmem>>, vector<1x126xi32>
    %c0_i32 = arith.constant 0 : i32
    %41 = vector.broadcast %c0_i32 : i32 to vector<1x126xi32>
    %42 = arith.cmpi eq, %40, %41 : vector<1x126xi32>
    %43 = vector.shape_cast %42 : vector<1x126xi1> to vector<1x126xi1>
    %44 = vector.broadcast %43 : vector<1x126xi1> to vector<32x126xi1>
    %45 = arith.select %44, %35, %39 : vector<32x126xi1>, vector<32x126xf32>
    %c0_12 = arith.constant 0 : index
    %c0_13 = arith.constant 0 : index
    %46 = vector.load %arg5[%c0_12, %c0_13] : memref<32x126xf32, #tpu.memory_space<vmem>>, vector<32x126xf32>
    tpu.vector_store %arg5[%c0_12, %c0_13], %45 {strides = array<i32>} : memref<32x126xf32, #tpu.memory_space<vmem>>, vector<32x126xf32>,
    return
  }
  func.func @transform_0(%arg0: i32) -> (i32, i32) {
    %c0_i32 = arith.constant 0 : i32
    %c0_i32_0 = arith.constant 0 : i32
    %c0_i32_1 = arith.constant 0 : i32
    return %c0_i32, %c0_i32_0 : i32, i32
  }
  func.func @transform_1(%arg0: i32) -> (i32, i32) {
    %c0_i32 = arith.constant 0 : i32
    %c0_i32_0 = arith.constant 0 : i32
    %c0_i32_1 = arith.constant 0 : i32
    return %c0_i32, %c0_i32_0 : i32, i32
  }
  func.func @transform_2(%arg0: i32) -> (i32, i32) {
    %c0_i32 = arith.constant 0 : i32
    %c0_i32_0 = arith.constant 0 : i32
    %c0_i32_1 = arith.constant 0 : i32
    return %c0_i32, %c0_i32_0 : i32, i32
  }
  func.func @transform_3(%arg0: i32) -> (i32, i32) {
    %c0_i32 = arith.constant 0 : i32
    %c0_i32_0 = arith.constant 0 : i32
    return %arg0, %c0_i32 : i32, i32
  }
  func.func @transform_4(%arg0: i32) -> (i32, i32) {
    %c0_i32 = arith.constant 0 : i32
    %c0_i32_0 = arith.constant 0 : i32
    return %arg0, %c0_i32 : i32, i32
  }
}

</mosaic_0001>

<bundles_post_ra>
// kernel: tpu_custom_call.1
= control target key start
LH: loop header
LB: loop body
LE: loop exit
PB: predicated region body
PF: predicated region fallthrough
CT: control target
= control target key end

     0   :  { %9 = vsyncpa [#allocation3], 0  ;;  %s1544_s0 = inlined_call_operand.vmem [shape: f32[6,126], index: 0, kind: input, shape index: {}]   ;;  %s1545_s1 = inlined_call_operand.vmem [shape: s32[1,126], index: 1, kind: input, shape index: {}]   ;;  %s1546_s2 = inlined_call_operand.vmem [shape: f32[1,126], index: 2, kind: input, shape index: {}]   ;;  %s1547_s3 = inlined_call_operand.vmem [shape: f32[256,6], index: 3, kind: input, shape index: {}]   ;;  %s1548_s4 = inlined_call_operand.hbm [shape: f32[256,126], index: 4, kind: output, shape index: {}]  }
   0x1   :  { %11 = vsyncpa [#allocation3 + $0x1], 0  ;;  %s1134_s15 = smov 0   ;;  %s1136_s16 = smov 0  }
   0x2   :  { %s1138_s17 = smov 0   ;;  %s1140_s18 = smov 0  }
   0x3 LB: > { %s1155_s19 = sadd.s32 4294967295, %s1092_s18   ;;  %s897_s20 = sadd.s32 4294967294, %s1092_s18   ;;  %s1092_s18 = sphi %s1140_s18, %s1558_s18   ;;  %s1088_s17 = sphi %s1138_s17, %s1557_s17   ;;  %s1084_s16 = sphi %s1136_s16, %s1556_s16   ;;  %s1080_s15 = sphi %s1134_s15, %s1555_s15  }
   0x4   : > { %s1159_s21 = sadd.s32 1, %s1092_s18   ;;  %s113_s22 = sadd.s32 1, %s1088_s17 }
   0x5   : > { %s110_s23 = ssub.s32 %s1092_s18, %s1159_s21  ;;  %p123_p0 = scmp.ne.s32.totalorder %s1088_s17, %s1084_s16 }
   0x6   : > { %p111_p1 = scmp.eq.s32.totalorder %s110_s23, 0  ;;  %p124_p2 = scmp.eq.s32.totalorder %s1155_s19, 7 }
   0x7   : > { %p129_p3 = scmp.ne.s32.totalorder %s1084_s16, %s1080_s15  ;;  %p130_p4 = scmp.eq.s32.totalorder %s897_s20, 7 }
   0x8   : > { %s1170_s24 = scalar_select %p111_p1, %s1088_s17, %s113_s22  }
   0x9   : > { %p1172_p5 = por %p124_p2, %p123_p0  ;;  %p1176_p6 = por %p130_p4, %p129_p3 }
   0xa   : > { %p900_p7 = scmp.ge.s32.totalorder %s1092_s18, 1  ;;  %p166_p8 = scmp.lt.s32.totalorder %s1092_s18, 9 }
   0xc   : > { %p167_p9 = pnand %p900_p7, %p166_p8 }
   0xd   : > { %s902_s27 = sshll.u32 (!%p167_p9), %s1155_s19, 2  ;;  %v1094_v0 = vmov (!%p167_p9), 0   ;;  %v1095_v5 = vmov (!%p167_p9), 1   ;;  %v1096_v6 = vmov (!%p167_p9), 2   ;;  %v1097_v7 = vmov (!%p167_p9), 3   ;;  %s932_s8 = sshll.u32 (!%p167_p9), %s1155_s19, 9 }
   0xe   : > { %170 = sbr.rel (%p167_p9) target bundleno = 360 (0x168), region = 36  ;;  %1003 = vset.pattern.permute.xlu1 (!%p167_p9), %v1094_v0  ;;  %1002 = vset.pattern.permute.xlu0 (!%p167_p9), %v1094_v0  ;;  %p193_p10 = scmp.lt.s32.totalorder (!%p167_p9), %s902_s27, 31  ;;  %v1098_v8 = vmov (!%p167_p9), 4   ;;  %v1099_v9 = vmov (!%p167_p9), 5   ;;  %v904_v10 = vld [vmem:[%s1544_s0] ss:$0 sm:$0xff] (!%p167_p9) }
   0xf   : > { %v905_v18 = vld [vmem:[%s1544_s0 + $0x1] ss:$0 sm:$0xff] (!%p167_p9)  ;;  %v906_v25 = vld [vmem:[%s1544_s0 + $0x2] ss:$0 sm:$0xff] (!%p167_p9)  ;;  %v907_v35 = vld [vmem:[%s1544_s0 + $0x3] ss:$0 sm:$0xff] (!%p167_p9)  ;;  %s1492_s12 = scalar_lea.hbm (!%p167_p9), %s1548_s4, %s932_s8 }
  0x10   : > { %v1203_v43 = vld [vmem:[%s1544_s0 + $0x5] ss:$0 sm:$0xff] (!%p167_p9)  ;;  %v908_v47 = vld [vmem:[%s1544_s0 + $0x4] ss:$0 sm:$0xff] (!%p167_p9)  ;;  %v1212_v58 = vld [vmem:[%s1546_s2] ss:$0 sm:$0xff] (!%p167_p9) }
  0x11   : > { %s1106_s14 = smov (!%p167_p9), [#allocation2]  }
  0x12   : > { %s1034_s20 = sshll.u32 (!%p167_p9), %s1106_s14, 4  ;;  %s1035_s20 = int_to_ptr.vmem [resolvable:$false] %s1034_s20 }
  0x13   : > { %s1036_s22 = scalar_lea.vmem (!%p167_p9), %s1035_s20, 1024 }
  0x15   : > { %s1560_s27 = smov (!%p193_p10, %s902_s27), 31 }
  0x16   : > { %s903_s28 = sshll.u32 %s1560_s27, 3 }
  0x17   : > { %s196_s5 = scalar_lea.vmem %s1547_s3, %s903_s28 }
  0x18   : > { %v201_v1 = vld [vmem:[%s196_s5 + $0x10] sm:$0xff]  ;;  %v199_v2 = vld [vmem:[%s196_s5] sm:$0xff]  ;;  %v202_v3 = vld [vmem:[%s196_s5 + $0x18] sm:$0xff] }
  0x19   : > { %216 = vperm.xlu1 %1003, %v201_v1   ;;  %206 = vperm.xlu0 %1002, %v199_v2   ;;  %v200_v4 = vld [vmem:[%s196_s5 + $0x8] sm:$0xff]  ;;  %s189_s5 = sand.u32 1, %s1084_s16  }
  0x1a   : > { %s901_s6 = sshll.u32 %s189_s5, 5  ;;  %s1503_s19 = scalar_lea.sflag [#allocation3], %s189_s5 }
  0x1b   : > { %s1438_s7 = scalar_lea.vmem [#allocation2], %s901_s6 }
  0x1c   : > { %s835_s9 = sshll.u32 %s1438_s7, 4  ;;  %s1494_s9 = int_to_ptr.vmem [resolvable:$true] %s835_s9 }
  0x1d   : > { %221 = vperm.xlu1 %1003, %v202_v3   ;;  %211 = vperm.xlu0 %1002, %v200_v4   ;;  %s1030_s13 = scalar_lea.vmem %s1494_s9, 512  ;;  %p1037_p0 = scmp.lt.s32.totalorder %s1494_s9, %s1035_s20 }
  0x1e   : > { %p1031_p11 = scmp.ne.s32.totalorder %s1494_s9, %s1030_s13  ;;  %p1038_p1 = scmp.lt.s32.totalorder %s1036_s22, %s1030_s13 }
  0x20   : > { %p1032_p12 = pnand %p1031_p11, %p1172_p5  ;;  %p1039_p2 = por %p1038_p1, %p1037_p0 }
  0x21   : > { %1005 = vset.pattern.permute.xlu1 %v1095_v5  ;;  %1004 = vset.pattern.permute.xlu0 %v1095_v5 }
  0x22   : > { %238 = vperm.xlu1 %1005, %v200_v4   ;;  %234 = vperm.xlu0 %1004, %v199_v2   ;;  %p1033_p13 = pneg %p1032_p12 }
  0x24   : > { %p1040_p3 = pnand %p1039_p2, %p1033_p13 }
  0x26   : > { %242 = vperm.xlu1 %1005, %v201_v1   ;;  %246 = vperm.xlu0 %1004, %v202_v3  }
  0x2a   : > { %1006 = vset.pattern.permute.xlu1 %v1096_v6  ;;  %1007 = vset.pattern.permute.xlu0 %v1096_v6 }
  0x2b   : > { %263 = vperm.xlu1 %1006, %v199_v2   ;;  %267 = vperm.xlu0 %1007, %v200_v4  }
  0x2f   : > { %271 = vperm.xlu1 %1006, %v201_v1   ;;  %1008 = vset.pattern.permute.xlu0 %v1097_v7 }
  0x30   : > { %292 = vperm.xlu0 %1008, %v199_v2  }
  0x33   : > { %275 = vperm.xlu1 %1006, %v202_v3  }
  0x34   : > { %304 = vperm.xlu0 %1008, %v202_v3  }
  0x37   : > { %1009 = vset.pattern.permute.xlu1 %v1097_v7 }
  0x38   : > { %296 = vperm.xlu1 %1009, %v200_v4   ;;  %1011 = vset.pattern.permute.xlu0 %v1098_v8 }
  0x39   : > { %325 = vperm.xlu0 %1011, %v200_v4  }
  0x3c   : > { %300 = vperm.xlu1 %1009, %v201_v1  }
  0x3d   : > { %1012 = vset.pattern.permute.xlu0 %v1099_v9 }
  0x3e   : > { %350 = vperm.xlu0 %1012, %v199_v2  }
  0x40   : > { %1010 = vset.pattern.permute.xlu1 %v1098_v8 }
  0x41   : > { %321 = vperm.xlu1 %1010, %v199_v2  }
  0x42   : > { %362 = vperm.xlu0 %1012, %v202_v3  }
  0x45   : > { %329 = vperm.xlu1 %1010, %v201_v1  }
  0x49   : > { %333 = vperm.xlu1 %1010, %v202_v3  }
  0x4d   : > { %1013 = vset.pattern.permute.xlu1 %v1099_v9 }
  0x4e   : > { %354 = vperm.xlu1 %1013, %v200_v4  }
  0x52   : > { %358 = vperm.xlu1 %1013, %v201_v1  }
  0x98   : > { %v217_v11 = vpop.permute.xlu1 %216  ;;  %v207_v12 = vpop.permute.xlu0 %206 }
  0x99   : > { %v230_v13 = vmul.f32 %v904_v10, %v217_v11  ;;  %v228_v32 = vmul.f32 %v904_v10, %v207_v12 }
  0x9c   : > { %v222_v14 = vpop.permute.xlu1 %221  ;;  %v212_v15 = vpop.permute.xlu0 %211 }
  0x9d   : > { %v231_v52 = vmul.f32 %v904_v10, %v222_v14  ;;  %v229_v54 = vmul.f32 %v904_v10, %v212_v15 }
  0xa1   : > { %v239_v16 = vpop.permute.xlu1 %238  ;;  %v235_v17 = vpop.permute.xlu0 %234 }
  0xa2   : > { %v253_v33 = vmul.f32 %v905_v18, %v235_v17  ;;  %v254_v55 = vmul.f32 %v905_v18, %v239_v16 }
  0xa4   : > { %v257_v37 = vadd.f32 %v253_v33, %v228_v32  ;;  %v258_v2 = vadd.f32 %v254_v55, %v229_v54  ;;  %v1105_v55 = vmov 1326507024  }
  0xa5   : > { %v243_v19 = vpop.permute.xlu1 %242  ;;  %v247_v20 = vpop.permute.xlu0 %246 }
  0xa6   : > { %v255_v21 = vmul.f32 %v905_v18, %v243_v19  ;;  %v256_v46 = vmul.f32 %v905_v18, %v247_v20 }
  0xa8   : > { %v259_v22 = vadd.f32 %v255_v21, %v230_v13  ;;  %v260_v57 = vadd.f32 %v256_v46, %v231_v52  ;;  %v1104_v52 = vmov 920167782  }
  0xaa   : > { %v264_v23 = vpop.permute.xlu1 %263  ;;  %v268_v24 = vpop.permute.xlu0 %267 }
  0xab   : > { %v282_v38 = vmul.f32 %v906_v25, %v264_v23  ;;  %v283_v60 = vmul.f32 %v906_v25, %v268_v24 }
  0xad   : > { %v286_v45 = vadd.f32 %v282_v38, %v257_v37  ;;  %v287_v8 = vadd.f32 %v283_v60, %v258_v2 }
  0xae   : > { %v272_v26 = vpop.permute.xlu1 %271 }
  0xaf   : > { %v284_v27 = vmul.f32 %v906_v25, %v272_v26  ;;  %v293_v28 = vpop.permute.xlu0 %292 }
  0xb0   : > { %v311_v41 = vmul.f32 %v907_v35, %v293_v28 }
  0xb1   : > { %v288_v29 = vadd.f32 %v284_v27, %v259_v22 }
  0xb2   : > { %v276_v30 = vpop.permute.xlu1 %275  ;;  %v315_v49 = vadd.f32 %v311_v41, %v286_v45  ;;  %v1101_v41 = vmov 2475754826  }
  0xb3   : > { %v305_v31 = vpop.permute.xlu0 %304  ;;  %v285_v53 = vmul.f32 %v906_v25, %v276_v30 }
  0xb4   : > { %v314_v1 = vmul.f32 %v907_v35, %v305_v31 }
  0xb5   : > { %v289_v63 = vadd.f32 %v285_v53, %v260_v57 }
  0xb7   : > { %v297_v34 = vpop.permute.xlu1 %296  ;;  %v318_v11 = vadd.f32 %v314_v1, %v289_v63 }
  0xb8   : > { %v326_v36 = vpop.permute.xlu0 %325  ;;  %v312_v3 = vmul.f32 %v907_v35, %v297_v34 }
  0xb9   : > { %v341_v15 = vmul.f32 %v908_v47, %v326_v36 }
  0xba   : > { %v316_v14 = vadd.f32 %v312_v3, %v287_v8 }
  0xbb   : > { %v301_v39 = vpop.permute.xlu1 %300 }
  0xbc   : > { %v313_v40 = vmul.f32 %v907_v35, %v301_v39  ;;  %v345_v23 = vadd.f32 %v341_v15, %v316_v14  ;;  %v1100_v39 = vmov 683565275  }
  0xbd   : > { %v351_v44 = vpop.permute.xlu0 %350 }
  0xbe   : > { %v317_v42 = vadd.f32 %v313_v40, %v288_v29  ;;  %v369_v51 = vmul.f32 %v1203_v43, %v351_v44  ;;  %v1102_v44 = vmov 2131351028  }
  0xc0   : > { %v322_v48 = vpop.permute.xlu1 %321 }
  0xc1   : > { %v340_v50 = vmul.f32 %v908_v47, %v322_v48  ;;  %v363_v6 = vpop.permute.xlu0 %362 }
  0xc2   : > { %v372_v13 = vmul.f32 %v1203_v43, %v363_v6 }
  0xc3   : > { %v344_v56 = vadd.f32 %v340_v50, %v315_v49  ;;  %v1103_v49 = vmov 2102212464  }
  0xc4   : > { %v330_v59 = vpop.permute.xlu1 %329 }
  0xc5   : > { %v1214_v61 = vadd.f32 %v369_v51, %v344_v56  ;;  %v342_v62 = vmul.f32 %v908_v47, %v330_v59 }
  0xc7   : > { %v1218_v4 = vadd.f32 %v1212_v58, %v1214_v61  ;;  %v1220_v5 = vadd.f32 %v342_v62, %v317_v42 }
  0xc8   : > { %v334_v7 = vpop.permute.xlu1 %333 }
  0xc9   : > { %v388_v9 = vand.u32 2147483647, %v1218_v4  ;;  %v391_v10 = vand.u32 2139095040, %v1218_v4  ;;  %v343_v12 = vmul.f32 %v908_v47, %v334_v7  ;;  %vm390_vm14 = vcmp.lt.s32.totalorder %v1218_v4, 0 }
  0xcb   : > { %v392_v16 = vshrl.u32 %v391_v10, 23  ;;  %v395_v17 = vand.u32 8388607, %v388_v9  ;;  %v347_v18 = vadd.f32 %v343_v12, %v318_v11  ;;  %vm1328_vm15 = vcmp.le.f32.partialorder %v388_v9, 0.7853982 }
  0xcd   : > { %v911_v19 = vadd.s32 4294967169, %v392_v16  ;;  %v355_v20 = vpop.permute.xlu1 %354  ;;  %v1227_v21 = vadd.f32 %v372_v13, %v347_v18  ;;  %v396_v25 = vor.u32 8388608, %v395_v17 }
  0xce   : > { %v370_v22 = vmul.f32 %v1203_v43, %v355_v20 }
  0xcf   : > { %v398_v24 = vadd.s32 1, %v911_v19  ;;  %v1232_v26 = vadd.f32 %v1212_v58, %v1227_v21  ;;  %v1238_v34 = vshll.u32 %v396_v25, 8 }
  0xd0   : > { %v1234_v27 = vadd.f32 %v370_v22, %v345_v23 }
  0xd1   : > { %vm399_vm0 = vcmp.gt.s32.totalorder %v398_v24, 0  ;;  %v700_v29 = vand.u32 2147483647, %v1232_v26  ;;  %v703_v30 = vand.u32 2139095040, %v1232_v26  ;;  %v359_v32 = vpop.permute.xlu1 %358 }
  0xd2   : > { %v400_v28 = vsel %vm399_vm0, %v398_v24, 0  ;;  %v1244_v38 = vadd.f32 %v1212_v58, %v1234_v27  ;;  %v371_v46 = vmul.f32 %v1203_v43, %v359_v32 }
  0xd3   : > { %v402_v31 = vand.u32 31, %v400_v28  ;;  %v401_v33 = vshrl.u32 %v400_v28, 5  ;;  %v704_v36 = vshrl.u32 %v703_v30, 23  ;;  %v707_v37 = vand.u32 8388607, %v700_v29 }
  0xd4   : > { %v495_v25 = vand.u32 2139095040, %v1244_v38  ;;  %v807_v30 = vlaneseq  ;;  %v1277_v32 = vadd.f32 %v371_v46, %v1220_v5 }
  0xd5   : > { %v403_v35 = vsub.s32 32, %v402_v31  ;;  %v405_v40 = vshll.u32 %v1100_v39, %v402_v31  ;;  %v408_v42 = vshll.u32 %v1101_v41, %v402_v31  ;;  %v411_v45 = vshll.u32 %v1102_v44, %v402_v31 }
  0xd6   : > { %v414_v51 = vshll.u32 %v1103_v49, %v402_v31  ;;  %v417_v54 = vshll.u32 %v1104_v52, %v402_v31  ;;  %vm420_vm1 = vcmp.lt.s32.totalorder %v401_v33, 1  ;;  %v923_v60 = vadd.s32 4294967169, %v704_v36 }
  0xd7   : > { %v406_v47 = vshrl.u32 %v1101_v41, %v403_v35  ;;  %v409_v48 = vshrl.u32 %v1102_v44, %v403_v35  ;;  %v412_v50 = vshrl.u32 %v1103_v49, %v403_v35  ;;  %v415_v53 = vshrl.u32 %v1104_v52, %v403_v35 }
  0xd8   : > { %v418_v56 = vshrl.u32 %v1105_v55, %v403_v35  ;;  %vm421_vm2 = vcmp.lt.s32.totalorder %v401_v33, 2  ;;  %vm423_vm3 = vcmp.lt.s32.totalorder %v401_v33, 4  ;;  %v404_v1 = vshrl.u32 %v1100_v39, %v403_v35 }
  0xd9   : > { %v407_v57 = vor.u32 %v406_v47, %v405_v40  ;;  %v410_v43 = vor.u32 %v409_v48, %v408_v42  ;;  %v413_v59 = vor.u32 %v412_v50, %v411_v45  ;;  %v416_v62 = vor.u32 %v415_v53, %v414_v51 }
  0xda   : > { %v419_v63 = vor.u32 %v418_v56, %v417_v54  ;;  %vm422_vm4 = vcmp.lt.s32.totalorder %v401_v33, 3  ;;  %v710_v10 = vadd.s32 1, %v923_v60  ;;  %v708_v17 = vor.u32 8388608, %v707_v37 }
  0xdb   : > { %v425_v2 = vsel %vm423_vm3, %v413_v59, 2102212464  ;;  %v428_v3 = vsel %vm420_vm1, %v407_v57, %v410_v43  ;;  %v432_v6 = vsel %vm420_vm1, %v410_v43, %v413_v59  ;;  %v429_v7 = vsel %vm423_vm3, %v416_v62, 920167782 }
  0xdc   : > { %v433_v8 = vsel %vm423_vm3, %v419_v63, 1326507024  ;;  %v424_v11 = vsel %vm420_vm1, %v404_v1, %v407_v57  ;;  %v426_v12 = vsel %vm422_vm4, %v410_v43, %v425_v2  ;;  %v430_v13 = vsel %vm422_vm4, %v413_v59, %v429_v7 }
  0xdd   : > { %v434_v14 = vsel %vm422_vm4, %v416_v62, %v433_v8  ;;  %v431_v15 = vsel %vm421_vm2, %v428_v3, %v430_v13  ;;  %vm711_vm5 = vcmp.gt.s32.totalorder %v710_v10, 0  ;;  %v427_v23 = vsel %vm421_vm2, %v424_v11, %v426_v12 }
  0xde   : > { %v435_v16 = vsel %vm421_vm2, %v432_v6, %v434_v14  ;;  %v1268_v20 = vmul.u32.u64.low %v1238_v34, %v431_v15  ;;  %v1269_v22 = vmul.u32.u64.high %v1238_v34, %v431_v15, %v1268_v20  ;;  %v712_v24 = vsel %vm711_vm5, %v710_v10, 0  ;;  %v804_v14 = vld [vmem:[%s1545_s1] sm:$0x1] }
  0xdf   : > { %v1264_v18 = vmul.u32.u64.low %v1238_v34, %v435_v16  ;;  %v1265_v19 = vmul.u32.u64.high %v1238_v34, %v435_v16, %v1264_v18  ;;  %v714_v28 = vand.u32 31, %v712_v24  ;;  %v1274_v31 = vshll.u32 %v708_v17, 8 }
  0xe0   : > { %v443_v35 = vmul.u32 %v1238_v34, %v427_v23  ;;  %v446_v36 = vadd.s32 1, %v1269_v22  ;;  %v713_v33 = vshrl.u32 %v712_v24, 5  ;;  %v496_v45 = vshrl.u32 %v495_v25, 23 }
  0xe1   : > { %vm445_vm6 = vc.u32 %v1265_v19, %v1268_v20  ;;  %v715_v37 = vsub.s32 32, %v714_v28  ;;  %v717_v40 = vshll.u32 %v1100_v39, %v714_v28  ;;  %v720_v42 = vshll.u32 %v1101_v41, %v714_v28 }
  0xe2   : > { %v447_v47 = vsel %vm445_vm6, %v446_v36, %v1269_v22  ;;  %v723_v34 = vshll.u32 %v1102_v44, %v714_v28  ;;  %v726_v51 = vshll.u32 %v1103_v49, %v714_v28  ;;  %v729_v57 = vshll.u32 %v1104_v52, %v714_v28 }
  0xe3   : > { %v718_v48 = vshrl.u32 %v1101_v41, %v715_v37  ;;  %v721_v5 = vshrl.u32 %v1102_v44, %v715_v37  ;;  %v448_v46 = vadd.s32 %v447_v47, %v443_v35  ;;  %v724_v50 = vshrl.u32 %v1103_v49, %v715_v37 }
  0xe4   : > { %v727_v53 = vshrl.u32 %v1104_v52, %v715_v37  ;;  %v730_v43 = vshrl.u32 %v1105_v55, %v715_v37  ;;  %v716_v60 = vshrl.u32 %v1100_v39, %v715_v37  ;;  %vm732_vm7 = vcmp.lt.s32.totalorder %v713_v33, 1 }
  0xe5   : > { %v719_v54 = vor.u32 %v718_v48, %v717_v40  ;;  %v722_v56 = vor.u32 %v721_v5, %v720_v42  ;;  %v449_v59 = vadd.s32 536870912, %v448_v46  ;;  %v725_v62 = vor.u32 %v724_v50, %v723_v34 }
  0xe6   : > { %v728_v63 = vor.u32 %v727_v53, %v726_v51  ;;  %v731_v1 = vor.u32 %v730_v43, %v729_v57  ;;  %vm733_vm8 = vcmp.lt.s32.totalorder %v713_v33, 2  ;;  %vm735_vm9 = vcmp.lt.s32.totalorder %v713_v33, 4 }
  0xe7   : > { %v450_v2 = vshrl.u32 %v449_v59, 30  ;;  %vm734_vm10 = vcmp.lt.s32.totalorder %v713_v33, 3  ;;  %v740_v3 = vsel %vm732_vm7, %v719_v54, %v722_v56  ;;  %v737_v7 = vsel %vm735_vm9, %v725_v62, 2102212464 }
  0xe8   : > { %v741_v6 = vsel %vm735_vm9, %v728_v63, 920167782  ;;  %v744_v10 = vsel %vm732_vm7, %v722_v56, %v725_v62  ;;  %v745_v11 = vsel %vm735_vm9, %v731_v1, 1326507024  ;;  %v736_v15 = vsel %vm732_vm7, %v716_v60, %v719_v54 }
  0xe9   : > { %v742_v8 = vsel %vm734_vm10, %v725_v62, %v741_v6  ;;  %v451_v12 = vshll.u32 %v450_v2, 30  ;;  %v746_v16 = vsel %vm734_vm10, %v728_v63, %v745_v11  ;;  %v738_v23 = vsel %vm734_vm10, %v722_v56, %v737_v7 }
  0xea   : > { %v743_v13 = vsel %vm733_vm8, %v740_v3, %v742_v8  ;;  %v747_v24 = vsel %vm733_vm8, %v744_v10, %v746_v16  ;;  %v915_v25 = vadd.s32 4294967169, %v496_v45  ;;  %v808_v28 = vshrl.u32 %v807_v30, 7 }
  0xeb   : > { %v1300_v17 = vmul.u32.u64.low %v1274_v31, %v743_v13  ;;  %v1301_v18 = vmul.u32.u64.high %v1274_v31, %v743_v13, %v1300_v17  ;;  %v452_v22 = vsub.s32 %v448_v46, %v451_v12  ;;  %vm805_vm11 = vcmp.eq.s32.totalorder %v804_v14, 0 }
  0xec   : > { %v1306_v35 = vmul.u32.u64.low %v1274_v31, %v747_v24  ;;  %v1307_v36 = vmul.u32.u64.high %v1274_v31, %v747_v24, %v1306_v35  ;;  %v492_v40 = vand.u32 2147483647, %v1244_v38  ;;  %v502_v42 = vadd.s32 1, %v915_v25 }
  0xed   : > { %v454_v37 = vsub.s32 0, %v452_v22  ;;  %v474_v47 = vsub.s32 4, %v450_v2  ;;  %v739_v48 = vsel %vm733_vm8, %v736_v15, %v738_v23  ;;  %v758_v5 = vadd.s32 1, %v1301_v18 }
  0xee   : > { %vm503_vm12 = vcmp.gt.s32.totalorder %v502_v42, 0  ;;  %v809_v46 = vsub.s32 0, %v808_v28  ;;  %v806_v45 = vsel %vm805_vm11, 1, %v1094_v0  ;;  %vm757_vm13 = vc.u32 %v1307_v36, %v1300_v17 }
  0xef   : > { %v912_v34 = vmin.u32 %v454_v37, %v452_v22  ;;  %v504_v30 = vsel %vm503_vm12, %v502_v42, 0  ;;  %v755_v51 = vmul.u32 %v1274_v31, %v739_v48  ;;  %v499_v33 = vand.u32 8388607, %v492_v40 }
  0xf0   : > { %v1321_v53 = vsel %vm390_vm14, %v474_v47, %v450_v2  ;;  %v759_v54 = vsel %vm757_vm13, %v758_v5, %v1301_v18  ;;  %v506_v56 = vand.u32 31, %v504_v30  ;;  %v1324_v43 = vrot.slane %v806_v45, %v809_v46 }
  0xf1   : > { %v456_v50 = vclz %v912_v34  ;;  %v760_v57 = vadd.s32 %v759_v54, %v755_v51  ;;  %v444_v31 = vadd.s32 %v1268_v20, %v1265_v19  ;;  %v477_v62 = vsel %vm1328_vm15, 0, %v1321_v53 }
  0xf2   : > { %v507_v60 = vsub.s32 32, %v506_v56  ;;  %v500_v1 = vor.u32 8388608, %v499_v33  ;;  %v505_v3 = vshrl.u32 %v504_v30, 5  ;;  %v509_v6 = vshll.u32 %v1100_v39, %v506_v56 }
  0xf3   : > { %v913_v0 = vadd.s32 4294967294, %v456_v50  ;;  %v761_v63 = vadd.s32 536870912, %v760_v57  ;;  %v1340_v9 = vadd.f32 %v1212_v58, %v1277_v32  ;;  %v515_v19 = vshll.u32 %v1102_v44, %v506_v56 }
  0xf4   : > { %v510_v20 = vshrl.u32 %v1101_v41, %v507_v60  ;;  %v513_v11 = vshrl.u32 %v1102_v44, %v507_v60  ;;  %v516_v12 = vshrl.u32 %v1103_v49, %v507_v60  ;;  %v519_v13 = vshrl.u32 %v1104_v52, %v507_v60 }
  0xf5   : > { %vm914_vm0 = vcmp.lt.s32.totalorder %v913_v0, 0  ;;  %v1342_v10 = vshrl.u32 %v761_v63, 30  ;;  %v512_v18 = vshll.u32 %v1101_v41, %v506_v56  ;;  %v518_v23 = vshll.u32 %v1103_v49, %v506_v56 }
  0xf6   : > { %v459_v2 = vsel %vm914_vm0, 0, %v913_v0  ;;  %v521_v24 = vshll.u32 %v1104_v52, %v506_v56  ;;  %v522_v25 = vshrl.u32 %v1105_v55, %v507_v60  ;;  %v517_v42 = vor.u32 %v516_v12, %v515_v19 }
  0xf7   : > { %v460_v7 = vsub.s32 32, %v459_v2  ;;  %v464_v8 = vsub.s32 4294967266, %v459_v2  ;;  %v461_v14 = vshll.u32 %v452_v22, %v459_v2  ;;  %v763_v58 = vshll.u32 %v1342_v10, 30 }
  0xf8   : > { %v511_v47 = vor.u32 %v510_v20, %v509_v6  ;;  %v514_v48 = vor.u32 %v513_v11, %v512_v18  ;;  %v520_v22 = vor.u32 %v519_v13, %v518_v23  ;;  %v523_v5 = vor.u32 %v522_v25, %v521_v24 }
  0xf9   : > { %v462_v15 = vshrl.u32 %v444_v31, %v460_v7  ;;  %v465_v16 = vadd.s32 127, %v464_v8  ;;  %v1354_v37 = vsub.s32 %v760_v57, %v763_v58  ;;  %v540_v45 = vshll.u32 %v500_v1, 8 }
  0xfa   : > { %v599_v30 = vand.u32 2139095040, %v1340_v9  ;;  %v508_v50 = vshrl.u32 %v1100_v39, %v507_v60  ;;  %vm524_vm1 = vcmp.lt.s32.totalorder %v505_v3, 1  ;;  %vm525_vm2 = vcmp.lt.s32.totalorder %v505_v3, 2 }
  0xfb   : > { %v463_v28 = vor.u32 %v462_v15, %v461_v14  ;;  %v466_v35 = vshll.u32 %v465_v16, 23  ;;  %v766_v46 = vsub.s32 0, %v1354_v37  ;;  %vm527_vm3 = vcmp.lt.s32.totalorder %v505_v3, 4 }
  0xfc   : > { %v529_v56 = vsel %vm527_vm3, %v517_v42, 2102212464  ;;  %v532_v0 = vsel %vm524_vm1, %v511_v47, %v514_v48  ;;  %v533_v57 = vsel %vm527_vm3, %v520_v22, 920167782  ;;  %v536_v31 = vsel %vm524_vm1, %v514_v48, %v517_v42 }
  0xfd   : > { %v467_v34 = vor.u32 4788187, %v466_v35  ;;  %v470_v33 = vcvt.s32.f32 %v463_v28  ;;  %v924_v54 = vmin.u32 %v766_v46, %v1354_v37  ;;  %v537_v63 = vsel %vm527_vm3, %v523_v5, 1326507024 }
  0xfe   : > { %vm702_vm4 = vcmp.lt.s32.totalorder %v1232_v26, 0  ;;  %vm526_vm5 = vcmp.lt.s32.totalorder %v505_v3, 3  ;;  %v600_v60 = vshrl.u32 %v599_v30, 23  ;;  %v528_v6 = vsel %vm524_vm1, %v508_v50, %v511_v47 }
  0xff   : > { %v468_v51 = vand.u32 2147483647, %v467_v34  ;;  %v768_v1 = vclz %v924_v54  ;;  %v530_v7 = vsel %vm526_vm5, %v514_v48, %v529_v56  ;;  %v534_v8 = vsel %vm526_vm5, %v517_v42, %v533_v57 }
 0x100   : > { %v538_v19 = vsel %vm526_vm5, %v520_v22, %v537_v63  ;;  %v535_v12 = vsel %vm525_vm2, %v532_v0, %v534_v8  ;;  %v531_v23 = vsel %vm525_vm2, %v528_v6, %v530_v7  ;;  %v919_v24 = vadd.s32 4294967169, %v600_v60 }
 0x101   : > { %v471_v2 = vmul.f32 %v470_v33, %v468_v51  ;;  %v925_v11 = vadd.s32 4294967294, %v768_v1  ;;  %v539_v13 = vsel %vm525_vm2, %v536_v31, %v538_v19  ;;  %v481_v28 = vadd.s32 3, %v477_v62 }
 0x102   : > { %v1366_v14 = vmul.u32.u64.low %v540_v45, %v539_v13  ;;  %v1367_v15 = vmul.u32.u64.high %v540_v45, %v539_v13, %v1366_v14  ;;  %v1369_v16 = vmul.u32.u64.low %v540_v45, %v535_v12  ;;  %v1370_v58 = vmul.u32.u64.high %v540_v45, %v535_v12, %v1369_v16 }
 0x103   : > { %v472_v20 = vxor.u32 2147483648, %v471_v2  ;;  %vm926_vm6 = vcmp.lt.s32.totalorder %v925_v11, 0  ;;  %v786_v42 = vsub.s32 4, %v1342_v10  ;;  %v756_v47 = vadd.s32 %v1300_v17, %v1307_v36 }
 0x104   : > { %v771_v35 = vsel %vm926_vm6, 0, %v925_v11  ;;  %v547_v22 = vmul.u32 %v540_v45, %v531_v23  ;;  %vm549_vm7 = vc.u32 %v1367_v15, %v1369_v16  ;;  %v550_v5 = vadd.s32 1, %v1370_v58 }
 0x105   : > { %v473_v18 = vsel %vm390_vm14, %v472_v20, %v471_v2  ;;  %v772_v48 = vsub.s32 32, %v771_v35  ;;  %v776_v3 = vsub.s32 4294967266, %v771_v35  ;;  %v773_v59 = vshll.u32 %v1354_v37, %v771_v35 }
 0x106   : > { %v476_v25 = vsel %vm1328_vm15, %v1218_v4, %v473_v18  ;;  %v606_v34 = vadd.s32 1, %v919_v24  ;;  %v482_v46 = vand.u32 3, %v481_v28  ;;  %v787_v30 = vsel %vm702_vm4, %v786_v42, %v1342_v10 }
 0x107   : > { %1014 = vcosq.f32 %v476_v25  ;;  %v774_v53 = vshrl.u32 %v756_v47, %v772_v48  ;;  %v777_v62 = vadd.s32 127, %v776_v3  ;;  %v551_v17 = vsel %vm549_vm7, %v550_v5, %v1370_v58 }
 0x108   : > { %1016 = vsinq.f32 %v476_v25  ;;  %v552_v45 = vadd.s32 %v551_v17, %v547_v22  ;;  %vm607_vm8 = vcmp.gt.s32.totalorder %v606_v34, 0  ;;  %v596_v51 = vand.u32 2147483647, %v1340_v9 }
 0x109   : > { %v775_v36 = vor.u32 %v774_v53, %v773_v59  ;;  %v778_v50 = vshll.u32 %v777_v62, 23  ;;  %v608_v33 = vsel %vm607_vm8, %v606_v34, 0  ;;  %vm811_vm9 = vcmp.eq.s32.totalorder %v1324_v43, 1 }
 0x10a   : > { %vm1398_vm10 = vcmp.le.f32.partialorder %v700_v29, 0.7853982  ;;  %v553_v10 = vadd.s32 536870912, %v552_v45  ;;  %vm816_vm11 = vcmask 1031168   ;;  %vm480_vm12 = vweird.f32 %v1218_v4 }
 0x10b   : > { %v779_v54 = vor.u32 4788187, %v778_v50  ;;  %v789_v56 = vsel %vm1398_vm10, 0, %v787_v30  ;;  %v610_v0 = vand.u32 31, %v608_v33  ;;  %vm483_vm13 = vcmp.lt.s32.totalorder %v482_v46, 2 }
 0x10c   : > { %v782_v31 = vcvt.s32.f32 %v775_v36  ;;  %v1405_v63 = vshrl.u32 %v553_v10, 30  ;;  %vm484_vm14 = vcmp.eq.s32.totalorder %v482_v46, 0  ;;  %vm487_vm15 = vcmp.eq.s32.totalorder %v482_v46, 2 }
 0x10d   : > { %v780_v57 = vand.u32 2147483647, %v779_v54  ;;  %v603_v29 = vand.u32 8388607, %v596_v51  ;;  %v611_v2 = vsub.s32 32, %v610_v0  ;;  %v793_v6 = vadd.s32 3, %v789_v56 }
 0x10e   : > { %v555_v7 = vshll.u32 %v1405_v63, 30  ;;  %v613_v8 = vshll.u32 %v1100_v39, %v610_v0  ;;  %v616_v12 = vshll.u32 %v1101_v41, %v610_v0  ;;  %v609_v23 = vshrl.u32 %v608_v33, 5 }
 0x10f   : > { %v783_v60 = vmul.f32 %v782_v31, %v780_v57  ;;  %v614_v11 = vshrl.u32 %v1101_v41, %v611_v2  ;;  %v617_v13 = vshrl.u32 %v1102_v44, %v611_v2  ;;  %v619_v35 = vshll.u32 %v1102_v44, %v610_v0 }
 0x110   : > { %v1417_v18 = vsub.s32 %v552_v45, %v555_v7  ;;  %v622_v48 = vshll.u32 %v1103_v49, %v610_v0  ;;  %v620_v5 = vshrl.u32 %v1103_v49, %v611_v2  ;;  %v623_v59 = vshrl.u32 %v1104_v52, %v611_v2 }
 0x111   : > { %v1015_v1 = vpop.eup %1014  ;;  %v784_v58 = vxor.u32 2147483648, %v783_v60  ;;  %v615_v25 = vor.u32 %v614_v11, %v613_v8  ;;  %v618_v28 = vor.u32 %v617_v13, %v616_v12  ;;  %v604_v62 = vor.u32 8388608, %v603_v29 }
 0x112   : > { %v1017_v19 = vpop.eup %1016  ;;  %v488_v20 = vxor.u32 2147483648, %v1015_v1  ;;  %v558_v47 = vsub.s32 0, %v1417_v18  ;;  %v621_v46 = vor.u32 %v620_v5, %v619_v35  ;;  %v624_v30 = vor.u32 %v623_v59, %v622_v48 }
 0x113   : > { %v485_v14 = vxor.u32 2147483648, %v1017_v19  ;;  %v785_v41 = vsel %vm702_vm4, %v784_v58, %v783_v60  ;;  %v612_v4 = vshrl.u32 %v1100_v39, %v611_v2  ;;  %vm628_vm0 = vcmp.lt.s32.totalorder %v609_v23, 1 }
 0x114   : > { %v489_v24 = vsel %vm487_vm15, %v488_v20, %v1017_v19  ;;  %v788_v22 = vsel %vm1398_vm10, %v1232_v26, %v785_v41  ;;  %v916_v53 = vmin.u32 %v558_v47, %v1417_v18  ;;  %vm629_vm1 = vcmp.lt.s32.totalorder %v609_v23, 2 }
 0x115   : > { %v486_v42 = vsel %vm484_vm14, %v1015_v1, %v485_v14  ;;  %1018 = vcosq.f32 %v788_v22  ;;  %v625_v17 = vshll.u32 %v1104_v52, %v610_v0  ;;  %v626_v36 = vshrl.u32 %v1105_v55, %v611_v2 }
 0x116   : > { %v490_v3 = vsel %vm483_vm13, %v486_v42, %v489_v24  ;;  %1020 = vsinq.f32 %v788_v22  ;;  %v560_v49 = vclz %v916_v53  ;;  %vm630_vm2 = vcmp.lt.s32.totalorder %v609_v23, 3 }
 0x117   : > { %v491_v44 = vsel %vm480_vm12, nan, %v490_v3  ;;  %vm631_vm3 = vcmp.lt.s32.totalorder %v609_v23, 4  ;;  %v632_v50 = vsel %vm628_vm0, %v612_v4, %v615_v25  ;;  %v636_v33 = vsel %vm628_vm0, %v615_v25, %v618_v28 }
 0x118   : > { %v812_v34 = vsel %vm811_vm9, %v1214_v61, %v491_v44  ;;  %v917_v61 = vadd.s32 4294967294, %v560_v49  ;;  %v633_v45 = vsel %vm631_vm3, %v621_v46, 2102212464  ;;  %v627_v37 = vor.u32 %v626_v36, %v625_v17 }
 0x119   : > { %817 = vst.msk [vmem:[%s1438_s7] sm:$0xff] %vm816_vm11, %v812_v34  ;;  %v634_v54 = vsel %vm630_vm2, %v618_v28, %v633_v45  ;;  %v637_v10 = vsel %vm631_vm3, %v624_v30, 920167782  ;;  %v640_v56 = vsel %vm628_vm0, %v618_v28, %v621_v46  ;;  %v794_v57 = vand.u32 3, %v793_v6 }
 0x11a   : > { %vm918_vm4 = vcmp.lt.s32.totalorder %v917_v61, 0  ;;  %v635_v39 = vsel %vm629_vm1, %v632_v50, %v634_v54  ;;  %v638_v31 = vsel %vm630_vm2, %v621_v46, %v637_v10  ;;  %v641_v0 = vsel %vm631_vm3, %v627_v37, 1326507024 }
 0x11b   : > { %v563_v52 = vsel %vm918_vm4, 0, %v917_v61  ;;  %v639_v55 = vsel %vm629_vm1, %v636_v33, %v638_v31  ;;  %v644_v29 = vshll.u32 %v604_v62, 8  ;;  %v548_v2 = vadd.s32 %v1369_v16, %v1367_v15 }
 0x11c   : > { %v564_v1 = vsub.s32 32, %v563_v52  ;;  %v568_v60 = vsub.s32 4294967266, %v563_v52  ;;  %v642_v7 = vsel %vm630_vm2, %v624_v30, %v641_v0  ;;  %v565_v8 = vshll.u32 %v1417_v18, %v563_v52 }
 0x11d   : > { %v643_v6 = vsel %vm629_vm1, %v640_v56, %v642_v7  ;;  %v1454_v19 = vmul.u32.u64.low %v644_v29, %v639_v55  ;;  %v1455_v20 = vmul.u32.u64.high %v644_v29, %v639_v55, %v1454_v19  ;;  %vm799_vm5 = vcmp.eq.s32.totalorder %v794_v57, 2 }
 0x11e   : > { %v566_v12 = vshrl.u32 %v548_v2, %v564_v1  ;;  %v569_v13 = vadd.s32 127, %v568_v60  ;;  %v1457_v14 = vmul.u32.u64.low %v644_v29, %v643_v6  ;;  %v1458_v58 = vmul.u32.u64.high %v644_v29, %v643_v6, %v1457_v14 }
 0x11f   : > { %v1019_v11 = vpop.eup %1018  ;;  %vm796_vm6 = vcmp.eq.s32.totalorder %v794_v57, 0  ;;  %v654_v18 = vadd.s32 1, %v1455_v20  ;;  %vm795_vm7 = vcmp.lt.s32.totalorder %v794_v57, 2  ;;  %vm792_vm8 = vweird.f32 %v1232_v26 }
 0x120   : > { %v1021_v24 = vpop.eup %1020  ;;  %v800_v25 = vxor.u32 2147483648, %v1019_v11  ;;  %v567_v16 = vor.u32 %v566_v12, %v565_v8  ;;  %v570_v28 = vshll.u32 %v569_v13, 23  ;;  %v652_v41 = vadd.s32 %v1454_v19, %v1458_v58 }
 0x121   : > { %v797_v15 = vxor.u32 2147483648, %v1021_v24  ;;  %v651_v48 = vmul.u32 %v644_v29, %v635_v39  ;;  %vm653_vm10 = vc.u32 %v1458_v58, %v1454_v19  ;;  %v578_v34 = vsub.s32 4, %v1405_v63 }
 0x122   : > { %v801_v35 = vsel %vm799_vm5, %v800_v25, %v1021_v24  ;;  %v571_v42 = vor.u32 4788187, %v570_v28  ;;  %v574_v5 = vcvt.s32.f32 %v567_v16  ;;  %v655_v59 = vsel %vm653_vm10, %v654_v18, %v1455_v20 }
 0x123   : > { %v798_v23 = vsel %vm796_vm6, %v1019_v11, %v797_v15  ;;  %v656_v53 = vadd.s32 %v655_v59, %v651_v48  ;;  %vm494_vm12 = vcmp.lt.s32.totalorder %v1244_v38, 0  ;;  %vm493_vm13 = vcmp.le.f32.partialorder %v492_v40, 0.7853982 }
 0x124   : > { %v802_v47 = vsel %vm795_vm7, %v798_v23, %v801_v35  ;;  %v572_v22 = vand.u32 2147483647, %v571_v42  ;;  %v579_v4 = vsel %vm494_vm12, %v578_v34, %v1405_v63  ;;  %vm584_vm1 = vweird.f32 %v1244_v38 }
 0x125   : > { %v803_v3 = vsel %vm792_vm8, nan, %v802_v47  ;;  %v657_v26 = vadd.s32 536870912, %v656_v53  ;;  %v581_v36 = vsel %vm493_vm13, 0, %v579_v4  ;;  %vm598_vm3 = vcmp.lt.s32.totalorder %v1340_v9, 0 }
 0x126   : > { %v815_v44 = vsel %vm811_vm9, %v1227_v21, %v803_v3  ;;  %v575_v62 = vmul.f32 %v574_v5, %v572_v22  ;;  %v585_v45 = vadd.s32 3, %v581_v36  ;;  %vm597_vm4 = vcmp.le.f32.partialorder %v596_v51, 0.7853982 }
 0x127   : > { %820 = vst.msk [vmem:[%s1438_s7 + $0x18] sm:$0xff] %vm816_vm11, %v815_v44  ;;  %v658_v30 = vshrl.u32 %v657_v26, 30  ;;  %vm688_vm8 = vweird.f32 %v1340_v9 }
 0x128   : > { %v576_v46 = vxor.u32 2147483648, %v575_v62  ;;  %v586_v54 = vand.u32 3, %v585_v45 }
 0x129   : > { %v659_v21 = vshll.u32 %v658_v30, 30 }
 0x12a   : > { %v577_v49 = vsel %vm494_vm12, %v576_v46, %v575_v62  ;;  %vm591_vm15 = vcmp.eq.s32.totalorder %v586_v54, 2  ;;  %vm588_vm0 = vcmp.eq.s32.totalorder %v586_v54, 0  ;;  %vm587_vm2 = vcmp.lt.s32.totalorder %v586_v54, 2 }
 0x12b   : > { %v580_v17 = vsel %vm493_vm13, %v1244_v38, %v577_v49  ;;  %v660_v61 = vsub.s32 %v656_v53, %v659_v21  ;;  %v682_v38 = vsub.s32 4, %v658_v30 }
 0x12c   : > { %1022 = vcosq.f32 %v580_v17 }
 0x12d   : > { %1024 = vsinq.f32 %v580_v17  ;;  %v662_v50 = vsub.s32 0, %v660_v61  ;;  %v683_v24 = vsel %vm598_vm3, %v682_v38, %v658_v30 }
 0x12e   : > { %v685_v25 = vsel %vm597_vm4, 0, %v683_v24 }
 0x12f   : > { %v920_v33 = vmin.u32 %v662_v50, %v660_v61  ;;  %v689_v15 = vadd.s32 3, %v685_v25 }
 0x131   : > { %v664_v37 = vclz %v920_v33  ;;  %v690_v16 = vand.u32 3, %v689_v15 }
 0x133   : > { %v921_v10 = vadd.s32 4294967294, %v664_v37  ;;  %vm695_vm5 = vcmp.eq.s32.totalorder %v690_v16, 2  ;;  %vm692_vm6 = vcmp.eq.s32.totalorder %v690_v16, 0  ;;  %vm691_vm7 = vcmp.lt.s32.totalorder %v690_v16, 2 }
 0x135   : > { %vm922_vm14 = vcmp.lt.s32.totalorder %v921_v10, 0 }
 0x136   : > { %v1023_v56 = vpop.eup %1022  ;;  %v667_v63 = vsel %vm922_vm14, 0, %v921_v10 }
 0x137   : > { %v1025_v57 = vpop.eup %1024  ;;  %v592_v39 = vxor.u32 2147483648, %v1023_v56  ;;  %v668_v52 = vsub.s32 32, %v667_v63  ;;  %v672_v55 = vsub.s32 4294967266, %v667_v63  ;;  %v669_v2 = vshll.u32 %v660_v61, %v667_v63 }
 0x138   : > { %v589_v40 = vxor.u32 2147483648, %v1025_v57 }
 0x139   : > { %v593_v31 = vsel %vm591_vm15, %v592_v39, %v1025_v57  ;;  %v670_v1 = vshrl.u32 %v652_v41, %v668_v52  ;;  %v673_v60 = vadd.s32 127, %v672_v55 }
 0x13a   : > { %v590_v0 = vsel %vm588_vm0, %v1023_v56, %v589_v40 }
 0x13b   : > { %v594_v29 = vsel %vm587_vm2, %v590_v0, %v593_v31  ;;  %v671_v6 = vor.u32 %v670_v1, %v669_v2  ;;  %v674_v19 = vshll.u32 %v673_v60, 23 }
 0x13c   : > { %v595_v7 = vsel %vm584_vm1, nan, %v594_v29 }
 0x13d   : > { %v813_v8 = vsel %vm811_vm9, %v1234_v27, %v595_v7  ;;  %v675_v20 = vor.u32 4788187, %v674_v19  ;;  %v678_v12 = vcvt.s32.f32 %v671_v6 }
 0x13e   : > { %818 = vst.msk [vmem:[%s1438_s7 + $0x8] sm:$0xff] %vm816_vm11, %v813_v8 }
 0x13f   : > { %v676_v11 = vand.u32 2147483647, %v675_v20 }
 0x141   : > { %v679_v13 = vmul.f32 %v678_v12, %v676_v11 }
 0x143   : > { %v680_v14 = vxor.u32 2147483648, %v679_v13 }
 0x145   : > { %v681_v58 = vsel %vm598_vm3, %v680_v14, %v679_v13 }
 0x146   : > { %v684_v27 = vsel %vm597_vm4, %v1340_v9, %v681_v58 }
 0x147   : > { %1026 = vcosq.f32 %v684_v27 }
 0x148   : > { %1028 = vsinq.f32 %v684_v27 }
 0x151   : > { %v1027_v28 = vpop.eup %1026 }
 0x152   : > { %v1029_v35 = vpop.eup %1028  ;;  %v696_v18 = vxor.u32 2147483648, %v1027_v28 }
 0x153   : > { %v693_v23 = vxor.u32 2147483648, %v1029_v35 }
 0x154   : > { %v697_v51 = vsel %vm695_vm5, %v696_v18, %v1029_v35 }
 0x155   : > { %v694_v42 = vsel %vm692_vm6, %v1027_v28, %v693_v23 }
 0x156   : > { %v698_v41 = vsel %vm691_vm7, %v694_v42, %v697_v51 }
 0x157   : > { %v699_v47 = vsel %vm688_vm8, nan, %v698_v41 }
 0x158   : > { %v814_v48 = vsel %vm811_vm9, %v1277_v32, %v699_v47 }
 0x159   : > { %819 = vst.msk [vmem:[%s1438_s7 + $0x10] sm:$0xff] %vm816_vm11, %v814_v48 }
 0x15a   : > { %1043 = shalt.err (!%p1040_p3)
}
 0x15b   : > { %s1044_s23 = scalar_lea.hbm %s1492_s12, 512  ;;  %s1048_s29 = scalar_lea.hbm %s1548_s4, 4096 }
 0x15c   : > { %p1045_p4 = scmp.ne.s32.totalorder %s1492_s12, %s1044_s23  ;;  %p1049_p9 = scmp.lt.u32.totalorder %s1492_s12, %s1548_s4 }
 0x15d   : > { %p1050_p10 = scmp.lt.u32.totalorder %s1048_s29, %s1044_s23  ;;  %p1052_p12 = scmp.lt.u32.totalorder %s1044_s23, %s1492_s12 }
 0x15e   : > { %p1046_p7 = pnand %p1045_p4, %p1172_p5 }
 0x15f   : > { %p1051_p11 = por %p1050_p10, %p1049_p9 }
 0x160   : > { %p1047_p8 = pneg %p1046_p7 }
 0x161   : > { %p1053_p13 = por %p1052_p12, %p1051_p11 }
 0x163   : > { %p1054_p0 = pnand %p1053_p13, %p1047_p8 }
 0x165   : > { %1057 = shalt.err (!%p1054_p0)
}
 0x166   : > { %s1107_s6 = smov 128   ;;  %s1108_s7 = smov 8  }
 0x167   : > { %949 = dma.vmem_to_hbm [thread:$0]  (%p1172_p5), %s1494_s9, 512, %s1492_s12, %s1503_s19, %s1107_s6, %s1107_s6, %s1108_s7  }
 0x168 PF: > { %p955_p1 = scmp.ge.s32.totalorder %s1092_s18, 2  ;;  %s850_s8 = sand.u32 1, %s1080_s15  }
 0x169   : > { %s851_s10 = scalar_lea.sflag [#allocation3], %s850_s8 }
 0x16a   : > { %p952_p2 = pnand %p955_p1, %p1176_p6 }
 0x16c   : > { %1075 = dma.done.wait (!%p952_p2), %s851_s10, 512  }
 0x16d   : > { %1077 = vsyncadd (!%p952_p2), %s851_s10, 4294966784  ;;  %p14_p3 = scmp.ge.s32.totalorder %s1159_s21, 10   ;;  %s1555_s15 = smov %s1084_s16 }
 0x16e   : > { %s1556_s16 = smov %s1088_s17  ;;  %s1557_s17 = smov %s1170_s24 }
 0x16f   : > { %s1558_s18 = smov %s1159_s21  ;;  %16 = sbr.rel (!%p14_p3) target bundleno = 3 (0x3), region = 71 }
 0x176   :  { %856 = vsyncpa [#allocation3], 1 }
 0x177   :  { %858 = vsyncpa [#allocation3 + $0x1], 1 }

</bundles_post_ra>
